<compile_context>
chip_gen: v5e
topology: v5e:2x2
jax: 0.10.0
libtpu: 0.0.40
codegen_flags: <defaults>
</compile_context>

<pallas_src>
import functools

import jax
import jax.numpy as jnp
from jax.experimental import pallas as pl
from jax.experimental.pallas import tpu as pltpu


def _round_up(n, m):
    return ((n + m - 1) // m) * m


def _mlp_kernel(x_ref, w1_ref, b1_ref, w2_ref, b2_ref, o_ref):
    # Layer 1: MXU matmul, f32 accumulation; bias + ReLU epilogue in f32.
    h = jnp.dot(x_ref[...], w1_ref[...], preferred_element_type=jnp.float32)
    h = jnp.maximum(h + b1_ref[...], 0.0)                 # (TM, H) + (1, H)
    # Layer 2: cast the activation back to the weight dtype (no-op for f32) so
    # a bf16 weight path keeps feeding the bf16 MXU; accumulate in f32.
    out = jnp.dot(h.astype(w2_ref.dtype), w2_ref[...],
                  preferred_element_type=jnp.float32)
    # Narrow (num_classes-wide) store: masked vst, minimal output HBM bytes.
    o_ref[...] = (out + b2_ref[...]).astype(o_ref.dtype)


@functools.partial(jax.jit, static_argnames=("block_batch", "compute_dtype"))
def neural_net_forward(x, w1, b1, w2, b2, *, block_batch=2048,
                       compute_dtype=jnp.float32):
    """Fused forward pass: relu(x @ w1 + b1) @ w2 + b2.

    x : (B, input_size)
    w1: (input_size, hidden)        (== PyTorch l1.weight.T)
    b1: (hidden,) or (1, hidden)
    w2: (hidden, num_classes)       (== PyTorch l2.weight.T)
    b2: (num_classes,) or (1, num_classes)
    """
    B, in_size = x.shape
    hidden = w1.shape[1]
    num_classes = w2.shape[1]
    itemsize = jnp.dtype(compute_dtype).itemsize

    xc = x.astype(compute_dtype)
    w1c = w1.astype(compute_dtype)            # no-op if pre-cast outside
    w2c = w2.astype(compute_dtype)
    b1c = b1.reshape(1, hidden).astype(jnp.float32)
    b2c = b2.reshape(1, num_classes).astype(jnp.float32)

    # ---- batch tile ---------------------------------------------------------
    # Sublane multiple: 8 for f32 vregs, 16 for packed bf16 vregs.
    mult = 16 if itemsize == 2 else 8
    # Cap tm at ~ceil(B/2) so there are >= 2 grid steps whenever possible
    # (lets v7x shard the "parallel" batch axis over both TensorCores).
    tm = min(block_batch, _round_up(max(pl.cdiv(B, 2), 1), mult))
    tm = max(tm, mult)

    # Fit double-buffered streamed tiles (+ weights, conservatively assumed
    # double-buffered) under a budget that is safe on all generations.
    per_row_bytes = in_size * itemsize + num_classes * 4
    weight_bytes = 2 * (in_size * hidden * itemsize
                        + hidden * num_classes * itemsize
                        + (hidden + num_classes) * 4)
    vmem_target = 40 << 20                    # < v7x 64 MiB physical per core
    while tm > mult and 2 * tm * per_row_bytes + weight_bytes > vmem_target:
        tm = _round_up(tm // 2, mult)

    # Ragged last block: no x padding copy, no dead output rows.  OOB input
    # rows produce garbage that is masked on output writeback (no cross-row
    # reduction), so results for rows < B are unaffected.
    grid = (pl.cdiv(B, tm),)

    vmem_limit = int(min(64 << 20,
                         max(16 << 20,
                             2 * tm * per_row_bytes + weight_bytes + (2 << 20))))

    cost = pl.CostEstimate(
        flops=2 * B * (in_size * hidden + hidden * num_classes),
        transcendentals=0,
        bytes_accessed=(B * in_size * itemsize        # x streamed in
                        + in_size * hidden * itemsize  # w1 (read once)
                        + hidden * num_classes * itemsize
                        + (hidden + num_classes) * 4   # biases
                        + B * num_classes * 4),        # narrow output stream
    )

    return pl.pallas_call(
        _mlp_kernel,
        out_shape=jax.ShapeDtypeStruct((B, num_classes), jnp.float32),
        grid_spec=pltpu.PrefetchScalarGridSpec(
            num_scalar_prefetch=0,
            grid=grid,
            in_specs=[
                pl.BlockSpec((tm, in_size), lambda i: (i, 0)),         # streamed
                pl.BlockSpec((in_size, hidden), lambda i: (0, 0)),     # resident
                pl.BlockSpec((1, hidden), lambda i: (0, 0)),           # resident
                pl.BlockSpec((hidden, num_classes), lambda i: (0, 0)), # resident
                pl.BlockSpec((1, num_classes), lambda i: (0, 0)),      # resident
            ],
            out_specs=pl.BlockSpec((tm, num_classes), lambda i: (i, 0)),
        ),
        compiler_params=pltpu.CompilerParams(
            dimension_semantics=("parallel",),   # megacore on v7x, no-op v5e/v6e
            vmem_limit_bytes=vmem_limit,
        ),
        cost_estimate=cost,
    )(xc, w1c, b1c, w2c, b2c)


def init_params(key, input_size, hidden_size, num_classes):
    """Deterministic init mimicking nn.Linear default (uniform +-1/sqrt(fan_in))."""
    k1, k2, k3, k4 = jax.random.split(key, 4)
    bound1 = 1.0 / jnp.sqrt(jnp.float32(input_size))
    bound2 = 1.0 / jnp.sqrt(jnp.float32(hidden_size))
    # Stored as (in, out) == PyTorch weight.T
    w1 = jax.random.uniform(k1, (input_size, hidden_size), jnp.float32, -bound1, bound1)
    b1 = jax.random.uniform(k2, (hidden_size,), jnp.float32, -bound1, bound1)
    w2 = jax.random.uniform(k3, (hidden_size, num_classes), jnp.float32, -bound2, bound2)
    b2 = jax.random.uniform(k4, (num_classes,), jnp.float32, -bound2, bound2)
    return w1, b1, w2, b2


if __name__ == "__main__":
    # Small shapes consistent with the module's forward: x is (batch, input_size).
    input_size, hidden_size, num_classes = 64, 32, 10

    key = jax.random.PRNGKey(0)
    kx, kp, kx2, kx3 = jax.random.split(key, 4)
    w1, b1, w2, b2 = init_params(kp, input_size, hidden_size, num_classes)

    # Case 1: tiny batch -> single tile, exact f32 path.
    x = jax.random.normal(kx, (8, input_size), jnp.float32)
    out = jax.block_until_ready(neural_net_forward(x, w1, b1, w2, b2))
    ref = jnp.maximum(x @ w1 + b1, 0.0) @ w2 + b2
    assert out.shape == (8, num_classes)
    assert jnp.allclose(out, ref, atol=1e-5, rtol=1e-5)

    # Case 2: batch grid with a ragged last block (40 rows, tm=16 -> 3 steps,
    # last step is partial) -- exercises the no-padding masked writeback path.
    x2 = jax.random.normal(kx2, (40, input_size), jnp.float32)
    out2 = jax.block_until_ready(
        neural_net_forward(x2, w1, b1, w2, b2, block_batch=16))
    ref2 = jnp.maximum(x2 @ w1 + b1, 0.0) @ w2 + b2
    assert out2.shape == (40, num_classes)
    assert jnp.allclose(out2, ref2, atol=1e-5, rtol=1e-5)

    # Case 3: bf16 operand path (v6e/v7x fast path).  Weights pre-cast once
    # outside the call (hoisted), looser tolerance for bf16 operand rounding.
    w1b, w2b = w1.astype(jnp.bfloat16), w2.astype(jnp.bfloat16)
    x3 = jax.random.normal(kx3, (1000, input_size), jnp.float32)
    out3 = jax.block_until_ready(
        neural_net_forward(x3, w1b, b1, w2b, b2, compute_dtype=jnp.bfloat16))
    ref3 = jnp.maximum(x3 @ w1 + b1, 0.0) @ w2 + b2
    assert out3.shape == (1000, num_classes)
    assert jnp.allclose(out3, ref3, atol=6e-2, rtol=6e-2)

    print("KERNEL_OK")
</pallas_src>

<mosaic_0001>
module attributes {stable_mosaic.version = 11 : i64} {
  func.func @_mlp_kernel(%arg0: i32, %arg1: memref<8x64xf32, #tpu.memory_space<vmem>>, %arg2: memref<64x32xf32, #tpu.memory_space<vmem>>, %arg3: memref<1x32xf32, #tpu.memory_space<vmem>>, %arg4: memref<32x10xf32, #tpu.memory_space<vmem>>, %arg5: memref<1x10xf32, #tpu.memory_space<vmem>>, %arg6: memref<8x10xf32, #tpu.memory_space<vmem>>) attributes {dimension_semantics = [#tpu.dimension_semantics<parallel>], iteration_bounds = array<i64: 1>, scalar_prefetch = 0 : i64, scratch_operands = 0 : i64, tpu.core_type = #tpu.core_type<tc>, window_params = [{transform_indices = @transform_0, window_bounds = array<i64: 8, 64>}, {pipeline_mode = #tpu.pipeline_mode<synchronous>, transform_indices = @transform_1, window_bounds = array<i64: 64, 32>}, {pipeline_mode = #tpu.pipeline_mode<synchronous>, transform_indices = @transform_2, window_bounds = array<i64: 1, 32>}, {pipeline_mode = #tpu.pipeline_mode<synchronous>, transform_indices = @transform_3, window_bounds = array<i64: 32, 10>}, {pipeline_mode = #tpu.pipeline_mode<synchronous>, transform_indices = @transform_4, window_bounds = array<i64: 1, 10>}, {transform_indices = @transform_5, window_bounds = array<i64: 8, 10>}]} {
    %c0 = arith.constant 0 : index
    %c0_0 = arith.constant 0 : index
    %0 = vector.load %arg1[%c0, %c0_0] : memref<8x64xf32, #tpu.memory_space<vmem>>, vector<8x64xf32>
    %c0_1 = arith.constant 0 : index
    %c0_2 = arith.constant 0 : index
    %1 = vector.load %arg2[%c0_1, %c0_2] : memref<64x32xf32, #tpu.memory_space<vmem>>, vector<64x32xf32>
    %cst = arith.constant dense<0.000000e+00> : vector<8x32xf32>
    %2 = tpu.matmul %0, %1, %cst {dimension_numbers = #tpu.dot_dimension_numbers<[1], [0], [0], [1], [0, 0, 1, 1], [], []>} : vector<8x64xf32>, vector<64x32xf32>, vector<8x32xf32> -> vector<8x32xf32>
    %c0_3 = arith.constant 0 : index
    %c0_4 = arith.constant 0 : index
    %3 = vector.load %arg3[%c0_3, %c0_4] : memref<1x32xf32, #tpu.memory_space<vmem>>, vector<1x32xf32>
    %4 = vector.broadcast %3 : vector<1x32xf32> to vector<8x32xf32>
    %5 = arith.addf %2, %4 : vector<8x32xf32>
    %cst_5 = arith.constant 0.000000e+00 : f32
    %6 = vector.broadcast %cst_5 : f32 to vector<8x32xf32>
    %7 = arith.maximumf %5, %6 : vector<8x32xf32>
    %c0_6 = arith.constant 0 : index
    %c0_7 = arith.constant 0 : index
    %8 = vector.load %arg4[%c0_6, %c0_7] : memref<32x10xf32, #tpu.memory_space<vmem>>, vector<32x10xf32>
    %cst_8 = arith.constant dense<0.000000e+00> : vector<8x10xf32>
    %9 = tpu.matmul %7, %8, %cst_8 {dimension_numbers = #tpu.dot_dimension_numbers<[1], [0], [0], [1], [0, 0, 1, 1], [], []>} : vector<8x32xf32>, vector<32x10xf32>, vector<8x10xf32> -> vector<8x10xf32>
    %c0_9 = arith.constant 0 : index
    %c0_10 = arith.constant 0 : index
    %10 = vector.load %arg5[%c0_9, %c0_10] : memref<1x10xf32, #tpu.memory_space<vmem>>, vector<1x10xf32>
    %11 = vector.broadcast %10 : vector<1x10xf32> to vector<8x10xf32>
    %12 = arith.addf %9, %11 : vector<8x10xf32>
    %c0_11 = arith.constant 0 : index
    %c0_12 = arith.constant 0 : index
    %13 = vector.load %arg6[%c0_11, %c0_12] : memref<8x10xf32, #tpu.memory_space<vmem>>, vector<8x10xf32>
    tpu.vector_store %arg6[%c0_11, %c0_12], %12 {strides = array<i32>} : memref<8x10xf32, #tpu.memory_space<vmem>>, vector<8x10xf32>,
    return
  }
  func.func @transform_0(%arg0: i32) -> (i32, i32) {
    %c0_i32 = arith.constant 0 : i32
    %c0_i32_0 = arith.constant 0 : i32
    return %arg0, %c0_i32 : i32, i32
  }
  func.func @transform_1(%arg0: i32) -> (i32, i32) {
    %c0_i32 = arith.constant 0 : i32
    %c0_i32_0 = arith.constant 0 : i32
    %c0_i32_1 = arith.constant 0 : i32
    return %c0_i32, %c0_i32_0 : i32, i32
  }
  func.func @transform_2(%arg0: i32) -> (i32, i32) {
    %c0_i32 = arith.constant 0 : i32
    %c0_i32_0 = arith.constant 0 : i32
    %c0_i32_1 = arith.constant 0 : i32
    return %c0_i32, %c0_i32_0 : i32, i32
  }
  func.func @transform_3(%arg0: i32) -> (i32, i32) {
    %c0_i32 = arith.constant 0 : i32
    %c0_i32_0 = arith.constant 0 : i32
    %c0_i32_1 = arith.constant 0 : i32
    return %c0_i32, %c0_i32_0 : i32, i32
  }
  func.func @transform_4(%arg0: i32) -> (i32, i32) {
    %c0_i32 = arith.constant 0 : i32
    %c0_i32_0 = arith.constant 0 : i32
    %c0_i32_1 = arith.constant 0 : i32
    return %c0_i32, %c0_i32_0 : i32, i32
  }
  func.func @transform_5(%arg0: i32) -> (i32, i32) {
    %c0_i32 = arith.constant 0 : i32
    %c0_i32_0 = arith.constant 0 : i32
    return %arg0, %c0_i32 : i32, i32
  }
}

</mosaic_0001>

<bundles_post_ra>
// kernel: neural_net_forward.1
= control target key start
LH: loop header
LB: loop body
LE: loop exit
PB: predicated region body
PF: predicated region fallthrough
CT: control target
= control target key end

     0   :  { %s219_s0 = inlined_call_operand.vmem [shape: f32[8,64], index: 0, kind: input, shape index: {}]   ;;  %s220_s1 = inlined_call_operand.vmem [shape: f32[64,32], index: 1, kind: input, shape index: {}]   ;;  %s221_s2 = inlined_call_operand.vmem [shape: f32[1,32], index: 2, kind: input, shape index: {}]   ;;  %s222_s3 = inlined_call_operand.vmem [shape: f32[32,10], index: 3, kind: input, shape index: {}]   ;;  %s223_s4 = inlined_call_operand.vmem [shape: f32[1,10], index: 4, kind: input, shape index: {}]   ;;  %s224_s5 = inlined_call_operand.hbm [shape: f32[8,10], index: 5, kind: output, shape index: {}]  }
   0x1   :  { %v29_v0 = vld [vmem:[%s220_s1 + $0x38] sm:$0xff]  ;;  %v28_v1 = vld [vmem:[%s220_s1 + $0x30] sm:$0xff]  ;;  %v27_v2 = vld [vmem:[%s220_s1 + $0x28] sm:$0xff] }
   0x2   :  { %46 = vmatpush.msra.mxu0 %v29_v0  ;;  %v62_v3 = vld [vmem:[%s222_s3 + $0x18] sm:$0xff]  ;;  %v26_v4 = vld [vmem:[%s220_s1 + $0x20] sm:$0xff] }
   0x3   :  { %83 = vmatpush.msra.mxu1 %v62_v3 }
   0x4   :  { %47 = vmatpush.msra.mxu0 %v28_v1 }
   0x5   :  { %10 = vsyncpa [#allocation3], 0  ;;  %v25_v5 = vld [vmem:[%s220_s1 + $0x18] sm:$0xff]  ;;  %v24_v6 = vld [vmem:[%s220_s1 + $0x10] sm:$0xff]  ;;  %vm34_vm0 = vcmask 523264   ;;  %vm67_vm1 = vcmask 261120  }
   0x6   :  { %48 = vmatpush.msra.mxu0 %v27_v2  ;;  %v23_v7 = vld [vmem:[%s220_s1 + $0x8] sm:$0xff]  ;;  %v22_v8 = vld [vmem:[%s220_s1] sm:$0xff]  ;;  %v61_v10 = vld [vmem:[%s222_s3 + $0x10] sm:$0xff]  ;;  %s140_s21 = smov [#allocation2]   ;;  %vm91_vm2 = vcmask 80896  }
   0x7   :  { %v21_v9 = vld [vmem:[%s219_s0] sm:$0xff]  ;;  %84 = vmatpush.msra.mxu1 %v61_v10  ;;  %v60_v11 = vld [vmem:[%s222_s3 + $0x8] sm:$0xff]  ;;  %s98_s22 = sshll.u32 %s140_s21, 4  ;;  %s99_s22 = int_to_ptr.vmem [resolvable:$true] %s98_s22 }
   0x8   :  { %49 = vmatpush.msra.mxu0 %v26_v4  ;;  %v59_v12 = vld [vmem:[%s222_s3] sm:$0xff]  ;;  %s100_s3 = sshll.u32 %s224_s5, 4  ;;  %s101_s3 = int_to_ptr.hbm [resolvable:$true] %s100_s3 }
   0x9   :  { %85 = vmatpush.msra.mxu1 %v60_v11  ;;  %v112_v13 = vld [vmem:[%s221_s2] ss:$0 sm:$0xff] }
   0xa   :  { %50 = vmatpush.msra.mxu0 %v25_v5  ;;  %v113_v17 = vld [vmem:[%s223_s4] ss:$0 sm:$0xff] }
   0xb   :  { %86 = vmatpush.msra.mxu1 %v59_v12 }
   0xc   :  { %51 = vmatpush.msra.mxu0 %v24_v6 }
   0xe   :  { %52 = vmatpush.msra.mxu0 %v23_v7 }
  0x10   :  { %53 = vmatpush.msra.mxu0 %v22_v8 }
  0x11   :  { %109 = vmatmul.msk.f32.vlgmr.msra.gmra.mxu0 %vm34_vm0, %v21_v9 }
  0x8e   :  { %v55_v14 = vpop.f32.mrf.mxu0 }
  0x8f   :  { %v56_v15 = vadd.f32 %v112_v13, %v55_v14 }
  0x91   :  { %v58_v16 = vmax.f32 %v56_v15, 0.0 }
  0x93   :  { %110 = vmatmul.msk.f32.vlgmr.msra.gmra.mxu1 %vm67_vm1, %v58_v16 }
 0x110   :  { %v88_v18 = vpop.f32.mrf.mxu1 }
 0x111   :  { %v89_v19 = vadd.f32 %v113_v17, %v88_v18 }
 0x113   :  { %92 = vst.msk [vmem:[#allocation2] sm:$0xff] %vm91_vm2, %v89_v19 }
 0x114   :  { %103 = dma.vmem_to_hbm [thread:$0]  %s99_s22, 128, %s101_s3, [#allocation3]  }
 0x115   :  { %138 = dma.done.wait [#allocation3], 128  }
 0x116   :  { %139 = vsyncadd [#allocation3], 4294967168 }
 0x117   :  { %108 = vsyncpa [#allocation3], 1 }

</bundles_post_ra>
